<compile_context>
chip_gen: v7x
topology: tpu7x:2x2x1
jax: 0.10.0
libtpu: 0.0.40
codegen_flags: <defaults>
</compile_context>

<pallas_src>
import math

import jax
import jax.numpy as jnp
import numpy as np
from jax import lax
from jax.experimental import pallas as pl
from jax.experimental.pallas import tpu as pltpu


def _san_kernel(pat_ref, w_ref, shift_ref, w1_ref, w2_ref, o_ref):
    # pat_ref  : (B_TILE, 9*Cin, HW)  bf16 im2col taps (tap-major, cin-minor)
    # w_ref    : (Cout, 9*Cin)        bf16 conv weights with BN scale folded in
    # shift_ref: (Cout, 1)            f32  folded BN shift + conv bias
    # w1_ref   : (Cmid, Cout) f32,  w2_ref: (Cout, Cmid) f32   SE 1x1-conv MLP
    # o_ref    : (B_TILE, Cout, HW)   f32
    b_tile = o_ref.shape[0]
    w = w_ref[...]
    shift = shift_ref[...]
    w1 = w1_ref[...]
    w2 = w2_ref[...]

    for b in range(b_tile):  # static unroll; b_tile is small and static
        # conv1 (3x3, stride 1, pad 1) as ONE K=9*Cin MXU matmul, f32 accumulate.
        acc = jnp.dot(w, pat_ref[b], preferred_element_type=jnp.float32)  # (Cout, HW)
        # folded BatchNorm2d (eval) + conv bias, then ReLU — f32 on the VPU.
        y = jnp.maximum(acc + shift, 0.0)                                  # (Cout, HW)

        # SpectralAttentionLayer.  mask = (x != 0); the isnan fixup in the
        # reference is a no-op (a 0/1 mask can never be NaN), so it is omitted.
        mask = (y != 0.0).astype(jnp.float32)
        avg = jnp.mean(y, axis=-1, keepdims=True)          # (Cout, 1) lane reduce
        mx = jnp.max(y, axis=-1, keepdims=True)            # (Cout, 1)
        pooled = jnp.concatenate([avg, mx], axis=-1)       # (Cout, 2): one fc pass
        h = jnp.maximum(
            jnp.dot(w1, pooled, preferred_element_type=jnp.float32), 0.0)  # (Cmid, 2)
        o2 = jnp.dot(w2, h, preferred_element_type=jnp.float32)            # (Cout, 2)
        se = jnp.sum(o2, axis=-1, keepdims=True)           # fc(avg)+fc(max): (Cout, 1)
        sa = jax.nn.sigmoid(se * mask)                     # (Cout, HW)
        o_ref[b] = y * sa


def spectral_attention_network(x_nchw, params):
    """Pallas forward. x_nchw: (N, Cin, H, W) f32 -> (N, Cout, H, W) f32."""
    n, cin, h, w = x_nchw.shape
    cout = params["conv_w"].shape[0]
    cmid = cout // 8
    hw = h * w
    k9 = 9 * cin

    # ---- glue: im2col built directly from NCHW (no layout transposes at all) --
    x = x_nchw.astype(jnp.float32)
    xp = jnp.pad(x, ((0, 0), (0, 0), (1, 1), (1, 1)))                    # padding=1
    patches = jnp.concatenate(
        [xp[:, :, dy:dy + h, dx:dx + w].reshape(n, cin, hw)
         for dy in range(3) for dx in range(3)], axis=1)                 # (N, 9*Cin, HW)

    # ---- fold conv bias + eval-mode BatchNorm into the weights / one shift ----
    eps = 1e-5
    bn_scale = params["bn_gamma"] / jnp.sqrt(params["bn_var"] + eps)     # (Cout,)
    # (Cout, Cin, 3, 3) -> (Cout, 3, 3, Cin) -> (Cout, 9*Cin), tap-major/cin-minor
    w2d = jnp.transpose(params["conv_w"], (0, 2, 3, 1)).reshape(cout, k9)
    w_folded = w2d * bn_scale[:, None]
    shift = (params["bn_beta"]
             + (params["conv_b"] - params["bn_mean"]) * bn_scale).reshape(cout, 1)

    # bf16 matmul operands (f32 accumulate in-kernel); elementwise stays f32.
    patches = patches.astype(jnp.bfloat16)
    w_folded = w_folded.astype(jnp.bfloat16)

    # SE 1x1-conv weights as matmul operands.
    w1 = params["fc1_w"].reshape(cmid, cout).astype(jnp.float32)         # (Cmid, Cout)
    w2 = params["fc2_w"].reshape(cout, cmid).astype(jnp.float32)         # (Cout, Cmid)

    # Several batch elements per grid step; weights stay resident (const index_map).
    b_tile = math.gcd(n, 8)
    grid = (n // b_tile,)
    # TODO(synk): for production H*W, additionally tile the HW axis (accumulating
    # avg/max in VMEM scratch across HW tiles) and set vmem_limit_bytes explicitly
    # so the 9x im2col block fits v7x's 64 MiB VMEM.

    out_flat = pl.pallas_call(
        _san_kernel,
        out_shape=jax.ShapeDtypeStruct((n, cout, hw), jnp.float32),
        grid_spec=pltpu.PrefetchScalarGridSpec(
            num_scalar_prefetch=0,
            grid=grid,
            in_specs=[
                pl.BlockSpec((b_tile, k9, hw), lambda i: (i, 0, 0)),
                pl.BlockSpec((cout, k9), lambda i: (0, 0)),
                pl.BlockSpec((cout, 1), lambda i: (0, 0)),
                pl.BlockSpec((cmid, cout), lambda i: (0, 0)),
                pl.BlockSpec((cout, cmid), lambda i: (0, 0)),
            ],
            out_specs=pl.BlockSpec((b_tile, cout, hw), lambda i: (i, 0, 0)),
        ),
        compiler_params=pltpu.CompilerParams(dimension_semantics=("parallel",)),
    )(patches, w_folded, shift, w1, w2)

    return out_flat.reshape(n, cout, h, w)   # already NCHW — no final transpose


def reference_jax(x_nchw, params):
    """Pure-JAX reference of the PyTorch forward (eval-mode BN)."""
    cout = params["conv_w"].shape[0]
    cmid = cout // 8
    x = jnp.transpose(x_nchw, (0, 2, 3, 1)).astype(jnp.float32)
    w_hwio = jnp.transpose(params["conv_w"], (2, 3, 1, 0))
    y = lax.conv_general_dilated(
        x, w_hwio, window_strides=(1, 1), padding=((1, 1), (1, 1)),
        dimension_numbers=("NHWC", "HWIO", "NHWC"),
        precision=lax.Precision.HIGHEST) + params["conv_b"]
    scale = params["bn_gamma"] / jnp.sqrt(params["bn_var"] + 1e-5)
    y = (y - params["bn_mean"]) * scale + params["bn_beta"]
    y = jnp.maximum(y, 0.0)
    mask = (y != 0.0).astype(jnp.float32)
    avg = jnp.mean(y, axis=(1, 2))
    mx = jnp.max(y, axis=(1, 2))
    w1 = params["fc1_w"].reshape(cmid, cout)
    w2 = params["fc2_w"].reshape(cout, cmid)

    def fc(v):
        return jnp.maximum(v @ w1.T, 0.0) @ w2.T

    out = fc(avg) + fc(mx)
    sa = jax.nn.sigmoid(out[:, None, None, :] * mask)
    return jnp.transpose(y * sa, (0, 3, 1, 2))


def init_params(key, num_bands, hsi_out_features):
    cmid = hsi_out_features // 8
    ks = jax.random.split(key, 8)
    return {
        "conv_w": 0.2 * jax.random.normal(ks[0], (hsi_out_features, num_bands, 3, 3), jnp.float32),
        "conv_b": 0.1 * jax.random.normal(ks[1], (hsi_out_features,), jnp.float32),
        "bn_gamma": 1.0 + 0.1 * jax.random.normal(ks[2], (hsi_out_features,), jnp.float32),
        "bn_beta": 0.1 * jax.random.normal(ks[3], (hsi_out_features,), jnp.float32),
        "bn_mean": 0.1 * jax.random.normal(ks[4], (hsi_out_features,), jnp.float32),
        "bn_var": 0.5 + jnp.abs(jax.random.normal(ks[5], (hsi_out_features,), jnp.float32)),
        "fc1_w": 0.3 * jax.random.normal(ks[6], (cmid, hsi_out_features, 1, 1), jnp.float32),
        "fc2_w": 0.3 * jax.random.normal(ks[7], (hsi_out_features, cmid, 1, 1), jnp.float32),
    }
    # TODO(synk): training-mode BatchNorm (batch statistics) is not implemented;
    # this kernel uses eval-mode running statistics folded into the weights.


if __name__ == "__main__":
    num_bands, hsi_out_features = 4, 32
    N, H, W = 2, 16, 16

    key = jax.random.PRNGKey(0)
    k_x, k_p = jax.random.split(key)
    x = jax.random.normal(k_x, (N, num_bands, H, W), jnp.float32)
    params = init_params(k_p, num_bands, hsi_out_features)

    out = spectral_attention_network(x, params)
    out = jax.block_until_ready(out)

    ref = jax.block_until_ready(reference_jax(x, params))
    np.testing.assert_allclose(np.asarray(out), np.asarray(ref), rtol=1e-2, atol=1e-2)

    assert out.shape == (N, hsi_out_features, H, W)
    print("KERNEL_OK")
</pallas_src>

<mosaic_0001>
module attributes {stable_mosaic.version = 11 : i64} {
  func.func @_san_kernel(%arg0: i32, %arg1: memref<2x36x256xbf16, #tpu.memory_space<vmem>>, %arg2: memref<32x36xbf16, #tpu.memory_space<vmem>>, %arg3: memref<32x1xf32, #tpu.memory_space<vmem>>, %arg4: memref<4x32xf32, #tpu.memory_space<vmem>>, %arg5: memref<32x4xf32, #tpu.memory_space<vmem>>, %arg6: memref<2x32x256xf32, #tpu.memory_space<vmem>>) attributes {dimension_semantics = [#tpu.dimension_semantics<parallel>], iteration_bounds = array<i64: 1>, scalar_prefetch = 0 : i64, scratch_operands = 0 : i64, tpu.core_type = #tpu.core_type<tc>, window_params = [{transform_indices = @transform_0, window_bounds = array<i64: 2, 36, 256>}, {pipeline_mode = #tpu.pipeline_mode<synchronous>, transform_indices = @transform_1, window_bounds = array<i64: 32, 36>}, {pipeline_mode = #tpu.pipeline_mode<synchronous>, transform_indices = @transform_2, window_bounds = array<i64: 32, 1>}, {pipeline_mode = #tpu.pipeline_mode<synchronous>, transform_indices = @transform_3, window_bounds = array<i64: 4, 32>}, {pipeline_mode = #tpu.pipeline_mode<synchronous>, transform_indices = @transform_4, window_bounds = array<i64: 32, 4>}, {transform_indices = @transform_5, window_bounds = array<i64: 2, 32, 256>}]} {
    %c0 = arith.constant 0 : index
    %c0_0 = arith.constant 0 : index
    %0 = vector.load %arg2[%c0, %c0_0] : memref<32x36xbf16, #tpu.memory_space<vmem>>, vector<32x36xbf16>
    %c0_1 = arith.constant 0 : index
    %c0_2 = arith.constant 0 : index
    %1 = vector.load %arg3[%c0_1, %c0_2] : memref<32x1xf32, #tpu.memory_space<vmem>>, vector<32x1xf32>
    %c0_3 = arith.constant 0 : index
    %c0_4 = arith.constant 0 : index
    %2 = vector.load %arg4[%c0_3, %c0_4] : memref<4x32xf32, #tpu.memory_space<vmem>>, vector<4x32xf32>
    %c0_5 = arith.constant 0 : index
    %c0_6 = arith.constant 0 : index
    %3 = vector.load %arg5[%c0_5, %c0_6] : memref<32x4xf32, #tpu.memory_space<vmem>>, vector<32x4xf32>
    %c0_7 = arith.constant 0 : index
    %c0_8 = arith.constant 0 : index
    %c0_9 = arith.constant 0 : index
    %4 = vector.load %arg1[%c0_7, %c0_8, %c0_9] : memref<2x36x256xbf16, #tpu.memory_space<vmem>>, vector<1x36x256xbf16>
    %5 = vector.shape_cast %4 : vector<1x36x256xbf16> to vector<36x256xbf16>
    %cst = arith.constant dense<0.000000e+00> : vector<32x256xf32>
    %6 = tpu.matmul %0, %5, %cst {dimension_numbers = #tpu.dot_dimension_numbers<[1], [0], [0], [1], [0, 0, 1, 1], [], []>} : vector<32x36xbf16>, vector<36x256xbf16>, vector<32x256xf32> -> vector<32x256xf32>
    %7 = vector.broadcast %1 : vector<32x1xf32> to vector<32x256xf32>
    %8 = arith.addf %6, %7 : vector<32x256xf32>
    %cst_10 = arith.constant 0.000000e+00 : f32
    %9 = vector.broadcast %cst_10 : f32 to vector<32x256xf32>
    %10 = arith.maximumf %8, %9 : vector<32x256xf32>
    %cst_11 = arith.constant 0.000000e+00 : f32
    %11 = vector.broadcast %cst_11 : f32 to vector<32x256xf32>
    %12 = arith.cmpf one, %10, %11 : vector<32x256xf32>
    %13 = arith.extui %12 : vector<32x256xi1> to vector<32x256xi32>
    %14 = arith.sitofp %13 : vector<32x256xi32> to vector<32x256xf32>
    %cst_12 = arith.constant dense<0.000000e+00> : vector<32xf32>
    %15 = vector.multi_reduction <add>, %10, %cst_12 [1] : vector<32x256xf32> to vector<32xf32>
    %16 = vector.shape_cast %15 : vector<32xf32> to vector<32x1xf32>
    %cst_13 = arith.constant 2.560000e+02 : f32
    %17 = vector.broadcast %cst_13 : f32 to vector<32x1xf32>
    %18 = arith.divf %16, %17 : vector<32x1xf32>
    %cst_14 = arith.constant dense<0xFF800000> : vector<32xf32>
    %19 = vector.multi_reduction <maximumf>, %10, %cst_14 [1] : vector<32x256xf32> to vector<32xf32>
    %20 = vector.shape_cast %19 : vector<32xf32> to vector<32x1xf32>
    %21 = tpu.concatenate %18, %20 in 1 : vector<32x1xf32>, vector<32x1xf32> -> vector<32x2xf32>
    %cst_15 = arith.constant dense<0.000000e+00> : vector<4x2xf32>
    %22 = tpu.matmul %2, %21, %cst_15 {dimension_numbers = #tpu.dot_dimension_numbers<[1], [0], [0], [1], [0, 0, 1, 1], [], []>} : vector<4x32xf32>, vector<32x2xf32>, vector<4x2xf32> -> vector<4x2xf32>
    %cst_16 = arith.constant 0.000000e+00 : f32
    %23 = vector.broadcast %cst_16 : f32 to vector<4x2xf32>
    %24 = arith.maximumf %22, %23 : vector<4x2xf32>
    %cst_17 = arith.constant dense<0.000000e+00> : vector<32x2xf32>
    %25 = tpu.matmul %3, %24, %cst_17 {dimension_numbers = #tpu.dot_dimension_numbers<[1], [0], [0], [1], [0, 0, 1, 1], [], []>} : vector<32x4xf32>, vector<4x2xf32>, vector<32x2xf32> -> vector<32x2xf32>
    %cst_18 = arith.constant dense<0.000000e+00> : vector<32xf32>
    %26 = vector.multi_reduction <add>, %25, %cst_18 [1] : vector<32x2xf32> to vector<32xf32>
    %27 = vector.shape_cast %26 : vector<32xf32> to vector<32x1xf32>
    %28 = vector.broadcast %27 : vector<32x1xf32> to vector<32x256xf32>
    %29 = arith.mulf %28, %14 : vector<32x256xf32>
    %30 = arith.negf %29 : vector<32x256xf32>
    %31 = math.exp %30 : vector<32x256xf32>
    %cst_19 = arith.constant 1.000000e+00 : f32
    %32 = vector.broadcast %cst_19 : f32 to vector<32x256xf32>
    %33 = arith.addf %32, %31 : vector<32x256xf32>
    %34 = arith.divf %32, %33 : vector<32x256xf32>
    %35 = arith.mulf %10, %34 : vector<32x256xf32>
    %c0_20 = arith.constant 0 : index
    %c0_21 = arith.constant 0 : index
    %c0_22 = arith.constant 0 : index
    %36 = vector.load %arg6[%c0_20, %c0_21, %c0_22] : memref<2x32x256xf32, #tpu.memory_space<vmem>>, vector<1x32x256xf32>
    %37 = vector.shape_cast %36 : vector<1x32x256xf32> to vector<32x256xf32>
    %38 = vector.shape_cast %35 : vector<32x256xf32> to vector<1x32x256xf32>
    tpu.vector_store %arg6[%c0_20, %c0_21, %c0_22], %38 {strides = array<i32>} : memref<2x32x256xf32, #tpu.memory_space<vmem>>, vector<1x32x256xf32>,
    %c1 = arith.constant 1 : index
    %c0_23 = arith.constant 0 : index
    %c0_24 = arith.constant 0 : index
    %39 = vector.load %arg1[%c1, %c0_23, %c0_24] : memref<2x36x256xbf16, #tpu.memory_space<vmem>>, vector<1x36x256xbf16>
    %40 = vector.shape_cast %39 : vector<1x36x256xbf16> to vector<36x256xbf16>
    %cst_25 = arith.constant dense<0.000000e+00> : vector<32x256xf32>
    %41 = tpu.matmul %0, %40, %cst_25 {dimension_numbers = #tpu.dot_dimension_numbers<[1], [0], [0], [1], [0, 0, 1, 1], [], []>} : vector<32x36xbf16>, vector<36x256xbf16>, vector<32x256xf32> -> vector<32x256xf32>
    %42 = vector.broadcast %1 : vector<32x1xf32> to vector<32x256xf32>
    %43 = arith.addf %41, %42 : vector<32x256xf32>
    %cst_26 = arith.constant 0.000000e+00 : f32
    %44 = vector.broadcast %cst_26 : f32 to vector<32x256xf32>
    %45 = arith.maximumf %43, %44 : vector<32x256xf32>
    %cst_27 = arith.constant 0.000000e+00 : f32
    %46 = vector.broadcast %cst_27 : f32 to vector<32x256xf32>
    %47 = arith.cmpf one, %45, %46 : vector<32x256xf32>
    %48 = arith.extui %47 : vector<32x256xi1> to vector<32x256xi32>
    %49 = arith.sitofp %48 : vector<32x256xi32> to vector<32x256xf32>
    %cst_28 = arith.constant dense<0.000000e+00> : vector<32xf32>
    %50 = vector.multi_reduction <add>, %45, %cst_28 [1] : vector<32x256xf32> to vector<32xf32>
    %51 = vector.shape_cast %50 : vector<32xf32> to vector<32x1xf32>
    %cst_29 = arith.constant 2.560000e+02 : f32
    %52 = vector.broadcast %cst_29 : f32 to vector<32x1xf32>
    %53 = arith.divf %51, %52 : vector<32x1xf32>
    %cst_30 = arith.constant dense<0xFF800000> : vector<32xf32>
    %54 = vector.multi_reduction <maximumf>, %45, %cst_30 [1] : vector<32x256xf32> to vector<32xf32>
    %55 = vector.shape_cast %54 : vector<32xf32> to vector<32x1xf32>
    %56 = tpu.concatenate %53, %55 in 1 : vector<32x1xf32>, vector<32x1xf32> -> vector<32x2xf32>
    %cst_31 = arith.constant dense<0.000000e+00> : vector<4x2xf32>
    %57 = tpu.matmul %2, %56, %cst_31 {dimension_numbers = #tpu.dot_dimension_numbers<[1], [0], [0], [1], [0, 0, 1, 1], [], []>} : vector<4x32xf32>, vector<32x2xf32>, vector<4x2xf32> -> vector<4x2xf32>
    %cst_32 = arith.constant 0.000000e+00 : f32
    %58 = vector.broadcast %cst_32 : f32 to vector<4x2xf32>
    %59 = arith.maximumf %57, %58 : vector<4x2xf32>
    %cst_33 = arith.constant dense<0.000000e+00> : vector<32x2xf32>
    %60 = tpu.matmul %3, %59, %cst_33 {dimension_numbers = #tpu.dot_dimension_numbers<[1], [0], [0], [1], [0, 0, 1, 1], [], []>} : vector<32x4xf32>, vector<4x2xf32>, vector<32x2xf32> -> vector<32x2xf32>
    %cst_34 = arith.constant dense<0.000000e+00> : vector<32xf32>
    %61 = vector.multi_reduction <add>, %60, %cst_34 [1] : vector<32x2xf32> to vector<32xf32>
    %62 = vector.shape_cast %61 : vector<32xf32> to vector<32x1xf32>
    %63 = vector.broadcast %62 : vector<32x1xf32> to vector<32x256xf32>
    %64 = arith.mulf %63, %49 : vector<32x256xf32>
    %65 = arith.negf %64 : vector<32x256xf32>
    %66 = math.exp %65 : vector<32x256xf32>
    %cst_35 = arith.constant 1.000000e+00 : f32
    %67 = vector.broadcast %cst_35 : f32 to vector<32x256xf32>
    %68 = arith.addf %67, %66 : vector<32x256xf32>
    %69 = arith.divf %67, %68 : vector<32x256xf32>
    %70 = arith.mulf %45, %69 : vector<32x256xf32>
    %c1_36 = arith.constant 1 : index
    %c0_37 = arith.constant 0 : index
    %c0_38 = arith.constant 0 : index
    %71 = vector.load %arg6[%c1_36, %c0_37, %c0_38] : memref<2x32x256xf32, #tpu.memory_space<vmem>>, vector<1x32x256xf32>
    %72 = vector.shape_cast %71 : vector<1x32x256xf32> to vector<32x256xf32>
    %73 = vector.shape_cast %70 : vector<32x256xf32> to vector<1x32x256xf32>
    tpu.vector_store %arg6[%c1_36, %c0_37, %c0_38], %73 {strides = array<i32>} : memref<2x32x256xf32, #tpu.memory_space<vmem>>, vector<1x32x256xf32>,
    return
  }
  func.func @transform_0(%arg0: i32) -> (i32, i32, i32) {
    %c0_i32 = arith.constant 0 : i32
    %c0_i32_0 = arith.constant 0 : i32
    %c0_i32_1 = arith.constant 0 : i32
    return %arg0, %c0_i32, %c0_i32_0 : i32, i32, i32
  }
  func.func @transform_1(%arg0: i32) -> (i32, i32) {
    %c0_i32 = arith.constant 0 : i32
    %c0_i32_0 = arith.constant 0 : i32
    %c0_i32_1 = arith.constant 0 : i32
    return %c0_i32, %c0_i32_0 : i32, i32
  }
  func.func @transform_2(%arg0: i32) -> (i32, i32) {
    %c0_i32 = arith.constant 0 : i32
    %c0_i32_0 = arith.constant 0 : i32
    %c0_i32_1 = arith.constant 0 : i32
    return %c0_i32, %c0_i32_0 : i32, i32
  }
  func.func @transform_3(%arg0: i32) -> (i32, i32) {
    %c0_i32 = arith.constant 0 : i32
    %c0_i32_0 = arith.constant 0 : i32
    %c0_i32_1 = arith.constant 0 : i32
    return %c0_i32, %c0_i32_0 : i32, i32
  }
  func.func @transform_4(%arg0: i32) -> (i32, i32) {
    %c0_i32 = arith.constant 0 : i32
    %c0_i32_0 = arith.constant 0 : i32
    %c0_i32_1 = arith.constant 0 : i32
    return %c0_i32, %c0_i32_0 : i32, i32
  }
  func.func @transform_5(%arg0: i32) -> (i32, i32, i32) {
    %c0_i32 = arith.constant 0 : i32
    %c0_i32_0 = arith.constant 0 : i32
    %c0_i32_1 = arith.constant 0 : i32
    return %arg0, %c0_i32, %c0_i32_0 : i32, i32, i32
  }
}

</mosaic_0001>

<bundles_post_ra>
// kernel: tpu_custom_call.1
= control target key start
LH: loop header
LB: loop body
LE: loop exit
PB: predicated region body
PF: predicated region fallthrough
CT: control target
= control target key end

     0   :  { %v1158_v2 = vmov 0   ;;  %vm102_vm0 = vcmask 1041408   ;;  %s1488_s0 = inlined_call_operand.vmem [shape: bf16[2,36,256], index: 0, kind: input, shape index: {}]   ;;  %s1489_s1 = inlined_call_operand.vmem [shape: bf16[32,36], index: 1, kind: input, shape index: {}]   ;;  %s1490_s2 = inlined_call_operand.vmem [shape: f32[32,1], index: 2, kind: input, shape index: {}]   ;;  %s1491_s3 = inlined_call_operand.vmem [shape: f32[4,32], index: 3, kind: input, shape index: {}]   ;;  %s1492_s4 = inlined_call_operand.vmem [shape: f32[32,4], index: 4, kind: input, shape index: {}]   ;;  %s1493_s5 = inlined_call_operand.hbm [shape: f32[2,32,256], index: 5, kind: output, shape index: {}]  }
   0x1   :  { %v1052_v0 = vld [vmem:[%s1488_s0 + $0x4] ss:$8 sps:$4 sm:$0xff]   ;;  %v1054_v1 = vld [vmem:[%s1488_s0] ss:$8 sps:$4 sm:$0xff]   ;;  %141 = vmatprep.mubr.bf16.mxu0 %v1158_v2  ;;  %1050 = vset.pattern.permute.xlu0 %v1158_v2  ;;  %v1055_v3 = vld [vmem:[%s1488_s0 + $0x14] ss:$8 sps:$4 sm:$0xff]  }
   0x2   :  { %109 = vmatprep.subr.bf16.mxu0 %v1052_v0  ;;  %v39_v4 = vld [vmem:[%s1488_s0 + $0x20] sm:$0x33]  ;;  %1051 = vset.pattern.permute.xlu1 %v1158_v2  ;;  %v1057_v5 = vld [vmem:[%s1488_s0 + $0x10] ss:$8 sps:$4 sm:$0xff]   ;;  %v27_v9 = vld [vmem:[%s1490_s2 + $0x8] sm:$0xff] }
   0x3   :  { %110 = vmatpush1.bf16.msra.mxu0 %v1054_v1  ;;  %v911_v6 = vcombine.high %v39_v4, %v39_v4  ;;  %v910_v7 = vcombine.low %v39_v4, %v39_v4  ;;  %v26_v8 = vld [vmem:[%s1490_s2] sm:$0xff]  ;;  %v28_v10 = vld [vmem:[%s1490_s2 + $0x10] sm:$0xff]  ;;  %v29_v11 = vld [vmem:[%s1490_s2 + $0x18] sm:$0xff] }
   0x4   :  { %111 = vmatprep.subr.bf16.mxu0 %v1055_v3  ;;  %42 = vperm.xlu0 %1050, %v26_v8  }
   0x5   :  { %52 = vperm.xlu1 %1051, %v28_v10  }
   0x7   :  { %112 = vmatpush1.bf16.msra.mxu0 %v1057_v5 }
   0x8   :  { %10 = vsyncpa [#allocation3], 0  ;;  %912 = vmatprep.subr.msk.bf16.mxu0 %vm102_vm0, %v911_v6  ;;  %v104_v12 = vsel %vm102_vm0, %v910_v7, 0  ;;  %v1230_v13 = vld [vmem:[%s1489_s1] sm:$0xff]   ;;  %47 = vperm.xlu0 %1050, %v27_v9   ;;  %vm95_vm1 = vcmask 293888   ;;  %v1238_v14 = vld [vmem:[%s1489_s1 + $0x8] sm:$0xff]  }
   0x9   :  { %57 = vperm.xlu1 %1051, %v29_v11   ;;  %v1159_v51 = vmov 0.0|0.0   ;;  %vm1160_vm2 = vmmov 0   ;;  %v1161_v52 = vmov 0.0   ;;  %vm223_vm3 = vcmask 7168   ;;  %v1302_v8 = vld [vmem:[%s1491_s3] sm:$0xf] }
   0xa   :  { %1031 = vmatprep.subr.bf16.mxu1 %v1159_v51  ;;  %1001 = vmatprep.mubr.msk.f32.mxu1 %vm1160_vm2, %v1161_v52  ;;  %vm228_vm4 = vcmask 261120   ;;  %v1309_v9 = vld [vmem:[%s1492_s4] sm:$0xff]  ;;  %vm303_vm5 = vcmask 31744   ;;  %vm316_vm6 = vcmask 1043456   ;;  %vm405_vm7 = vcmask 15360  }
   0xb   :  { %114 = vmatpush1.bf16.msra.mxu0 %v104_v12 }
   0xc   :  { %1037 = vmatprep.subr.bf16.mxu0 %v1159_v51 }
   0xe   :  { %913 = vmatmul.mubr.msk.bf16.vlgmr.msra.gmra.mrb[0].mxu0 %vm95_vm1, %v1230_v13 }
   0xf   :  { %151 = vmatprep.mubr.bf16.mxu0 %v1158_v2 }
  0x16   :  { %914 = vmatmul.mubr.msk.bf16.gmra.mrb[4].mxu0 %vm95_vm1, %v1238_v14 }
  0x17   :  { %1020 = vmatprep.mubr.msk.f32.mxu0 %vm1160_vm2, %v1161_v52 }
  0x83   :  { %v1242_v15 = vpop.permute.xlu0 %42 }
  0x84   :  { %v1248_v22 = vpop.permute.xlu1 %52 }
  0x87   :  { %v1244_v17 = vpop.permute.xlu0 %47 }
  0x88   :  { %v1262_v32 = vpop.permute.xlu1 %57 }
  0xe1   :  { %v143_v16 = vpop.f32.mrb[0].mxu0 }
  0xe2   :  { %v144_v18 = vadd.f32 %v143_v16, %v1242_v15  ;;  %v145_v19 = vpop.f32.mrb[1].mxu0  ;;  %v1064_v16 = vld [vmem:[%s1488_s0 + $0x2c] ss:$8 sps:$4 sm:$0xff]  }
  0xe3   :  { %v146_v20 = vadd.f32 %v145_v19, %v1242_v15  ;;  %v147_v21 = vpop.f32.mrb[2].mxu0  ;;  %v1062_v19 = vld [vmem:[%s1488_s0 + $0x28] ss:$8 sps:$4 sm:$0xff]  }
  0xe4   :  { %v1250_v23 = vmax.f32 %v144_v18, 0.0  ;;  %v148_v24 = vadd.f32 %v147_v21, %v1244_v17  ;;  %v149_v25 = vpop.f32.mrb[3].mxu0  ;;  %v1319_v18 = vld [vmem:[%s1492_s4 + $0x8] sm:$0xff]  ;;  %v1331_v21 = vld [vmem:[%s1492_s4 + $0x10] sm:$0xff] }
  0xe5   :  { %v1253_v26 = vmax.f32 %v146_v20, 0.0  ;;  %v150_v27 = vadd.f32 %v149_v25, %v1244_v17  ;;  %v1067_v20 = vld [vmem:[%s1488_s0 + $0x3c] ss:$8 sps:$4 sm:$0xff]   ;;  %v1065_v25 = vld [vmem:[%s1488_s0 + $0x38] ss:$8 sps:$4 sm:$0xff]  }
  0xe6   :  { %v1256_v28 = vmax.f32 %v148_v24, 0.0  ;;  %v941_v24 = vld [vmem:[%s1488_s0 + $0x48] sm:$0x33]  ;;  %vm170_vm9 = vcmp.ne.f32.partialorder %v1250_v23, 0.0  ;;  %s1162_s0 = smov [#allocation2]  }
  0xe7   :  { %v1258_v29 = vmax.f32 %v150_v27, 0.0  ;;  %v194_v30 = vadd.f32 %v1253_v26, %v1250_v23  ;;  %v211_v38 = vmax.f32 %v1250_v23, %v1253_v26  ;;  %v1347_v27 = vld [vmem:[%s1492_s4 + $0x18] sm:$0xff]  ;;  %vm171_vm8 = vcmp.ne.f32.partialorder %v1253_v26, 0.0  ;;  %s893_s4 = sshll.u32 %s1162_s0, 4  ;;  %s894_s4 = int_to_ptr.vmem [resolvable:$true] %s893_s4 }
  0xe8   :  { %vm172_vm10 = vcmp.ne.f32.partialorder %v1256_v28, 0.0  ;;  %s1134_s7 = scalar_lea.vmem %s894_s4, 2048  ;;  %p1139_p1 = scmp.lt.s32.totalorder %s894_s4, %s894_s4 }
  0xe9   :  { %v153_v31 = vpop.f32.mrb[4].mxu0  ;;  %195 = vadd.xlane.f32.xlu0 %v194_v30  ;;  %v197_v33 = vadd.f32 %v1258_v29, %v1256_v28  ;;  %v214_v47 = vmax.f32 %v1256_v28, %v1258_v29  ;;  %v947_v30 = vcombine.high %v941_v24, %v941_v24  ;;  %vm173_vm11 = vcmp.ne.f32.partialorder %v1258_v29, 0.0  ;;  %p1135_p0 = scmp.ne.s32.totalorder %s894_s4, %s1134_s7  ;;  %p1140_p2 = scmp.lt.s32.totalorder %s1134_s7, %s1134_s7 }
  0xea   :  { %v154_v34 = vadd.f32 %v153_v31, %v1248_v22  ;;  %v155_v35 = vpop.f32.mrb[5].mxu0  ;;  %v946_v31 = vcombine.low %v941_v24, %v941_v24 }
  0xeb   :  { %v156_v36 = vadd.f32 %v155_v35, %v1248_v22  ;;  %v157_v37 = vpop.f32.mrb[6].mxu0  ;;  %198 = vadd.xlane.f32.xlu1 %v197_v33  ;;  %p1141_p3 = por %p1140_p2, %p1139_p1 }
  0xec   :  { %v1270_v39 = vmax.f32 %v154_v34, 0.0  ;;  %v158_v40 = vadd.f32 %v157_v37, %v1262_v32  ;;  %v159_v41 = vpop.f32.mrb[7].mxu0  ;;  %v522_v33 = vsel %vm102_vm0, %v946_v31, 0 }
  0xed   :  { %v1273_v42 = vmax.f32 %v156_v36, 0.0  ;;  %v160_v43 = vadd.f32 %v159_v41, %v1262_v32  ;;  %212 = vmax.xlane.f32.xlu0 %v211_v38  ;;  %p1142_p4 = pnand %p1141_p3, %p1135_p0 }
  0xee   :  { %v1276_v44 = vmax.f32 %v158_v40, 0.0  ;;  %vm174_vm12 = vcmp.ne.f32.partialorder %v1270_v39, 0.0 }
  0xef   :  { %v1278_v45 = vmax.f32 %v160_v43, 0.0  ;;  %v200_v46 = vadd.f32 %v1273_v42, %v1270_v39  ;;  %v217_v48 = vmax.f32 %v1270_v39, %v1273_v42  ;;  %vm175_vm13 = vcmp.ne.f32.partialorder %v1273_v42, 0.0 }
  0xf0   :  { %vm176_vm14 = vcmp.ne.f32.partialorder %v1276_v44, 0.0 }
  0xf1   :  { %201 = vadd.xlane.f32.xlu1 %v200_v46  ;;  %215 = vmax.xlane.f32.xlu0 %v214_v47  ;;  %v203_v49 = vadd.f32 %v1278_v45, %v1276_v44  ;;  %v220_v50 = vmax.f32 %v1276_v44, %v1278_v45  ;;  %vm177_vm15 = vcmp.ne.f32.partialorder %v1278_v45, 0.0 }
  0xf5   :  { %218 = vmax.xlane.f32.xlu1 %v217_v48  ;;  %204 = vadd.xlane.f32.xlu0 %v203_v49 }
  0xf9   :  { %221 = vmax.xlane.f32.xlu0 %v220_v50 }
 0x176   :  { %v196_v53 = vpop.xlane.xlu0 %195 }
 0x177   :  { %v207_v56 = vmul.f32 0.00390625, %v196_v53 }
 0x178   :  { %v199_v54 = vpop.xlane.xlu1 %198 }
 0x179   :  { %v208_v57 = vmul.f32 0.00390625, %v199_v54 }
 0x17a   :  { %v213_v55 = vpop.xlane.xlu0 %212 }
 0x17b   :  { %v224_v60 = vsel %vm223_vm3, %v207_v56, %v213_v55 }
 0x17e   :  { %v202_v58 = vpop.xlane.xlu1 %201  ;;  %v216_v59 = vpop.xlane.xlu0 %215 }
 0x17f   :  { %v225_v61 = vsel %vm223_vm3, %v208_v57, %v216_v59  ;;  %v209_v1 = vmul.f32 0.00390625, %v202_v58 }
 0x180   :  { %v1032_v62 = vpack.c.bf16 %v225_v61, %v224_v60 }
 0x182   :  { %1033 = vmatpush3.bf16.msra.mxu1 %v1032_v62  ;;  %v205_v63 = vpop.xlane.xlu0 %204  ;;  %v219_v0 = vpop.xlane.xlu1 %218 }
 0x183   :  { %1034 = vmatprep.subr.bf16.mxu1 %v1159_v51  ;;  %v210_v3 = vmul.f32 0.00390625, %v205_v63  ;;  %v226_v5 = vsel %vm223_vm3, %v209_v1, %v219_v0 }
 0x186   :  { %v222_v4 = vpop.xlane.xlu0 %221 }
 0x187   :  { %v227_v6 = vsel %vm223_vm3, %v210_v3, %v222_v4 }
 0x188   :  { %v1035_v7 = vpack.c.bf16 %v227_v6, %v226_v5 }
 0x18a   :  { %1036 = vmatpush3.bf16.msra.mxu1 %v1035_v7 }
 0x18d   :  { %1002 = vmatmul.mubr.msk.f32.vlgmr.msra.gmra.mrb[0].mxu1 %vm228_vm4, %v1302_v8 }
 0x18e   :  { %1006 = vmatprep.mubr.msk.f32.mxu1 %vm303_vm5, %v1309_v9 }
 0x260   :  { %v298_v10 = vpop.f32.mrb[0].mxu1 }
 0x261   :  { %v302_v11 = vmax.f32 %v298_v10, 0.0  ;;  %v1003_v12 = vpop.f32.mrb[1].mxu1 }
 0x263   :  { %1004 = vmatprep.subr.msk.mxu1 %vm316_vm6, %v302_v11 }
 0x264   :  { %1005 = vmatpush3.msk.msra.mxu1 %vm316_vm6, %v302_v11 }
 0x265   :  { %1007 = vmatmul.mubr.msk.f32.vlgmr.msra.gmra.mrb[2].mxu1 %vm303_vm5, %v1319_v18  ;;  %527 = vmatprep.subr.bf16.mxu1 %v1064_v16 }
 0x266   :  { %528 = vmatpush1.bf16.msra.mxu1 %v1062_v19  ;;  %1009 = vmatprep.mubr.msk.f32.mxu1 %vm303_vm5, %v1331_v21 }
 0x267   :  { %529 = vmatprep.subr.bf16.mxu1 %v1067_v20 }
 0x269   :  { %1010 = vmatmul.mubr.msk.f32.gmra.mrb[4].mxu1 %vm303_vm5, %v1347_v27 }
 0x26a   :  { %530 = vmatpush1.bf16.msra.mxu1 %v1065_v25  ;;  %559 = vmatprep.mubr.bf16.mxu1 %v1158_v2 }
 0x26b   :  { %948 = vmatprep.subr.msk.bf16.mxu1 %vm102_vm0, %v947_v30 }
 0x26e   :  { %532 = vmatpush1.bf16.msra.mxu1 %v522_v33 }
 0x271   :  { %949 = vmatmul.mubr.msk.bf16.vlgmr.msra.gmra.mrb[8].mxu1 %vm95_vm1, %v1230_v13 }
 0x272   :  { %569 = vmatprep.mubr.bf16.mxu1 %v1158_v2 }
 0x279   :  { %950 = vmatmul.mubr.msk.bf16.gmra.mrb[12].mxu1 %vm95_vm1, %v1238_v14 }
 0x338   :  { %v1008_v34 = vpop.f32.mrb[2].mxu1 }
 0x339   :  { %v386_v35 = vpop.f32.mrb[3].mxu1  ;;  %v409_v7 = vsel %vm405_vm7, %v1008_v34, 0.0 }
 0x33a   :  { %v406_v6 = vsel %vm405_vm7, %v386_v35, 0.0 }
 0x33c   :  { %v1011_v36 = vpop.f32.mrb[4].mxu1 }
 0x33d   :  { %v396_v37 = vpop.f32.mrb[5].mxu1  ;;  %v415_v11 = vsel %vm405_vm7, %v1011_v36, 0.0 }
 0x33e   :  { %v412_v10 = vsel %vm405_vm7, %v396_v37, 0.0 }
 0x344   :  { %v561_v38 = vpop.f32.mrb[8].mxu1 }
 0x345   :  { %v562_v40 = vadd.f32 %v561_v38, %v1242_v15  ;;  %v563_v41 = vpop.f32.mrb[9].mxu1 }
 0x346   :  { %v564_v43 = vadd.f32 %v563_v41, %v1242_v15  ;;  %v565_v46 = vpop.f32.mrb[10].mxu1 }
 0x347   :  { %v1361_v47 = vmax.f32 %v562_v40, 0.0  ;;  %v566_v13 = vadd.f32 %v565_v46, %v1244_v17  ;;  %v567_v48 = vpop.f32.mrb[11].mxu1 }
 0x348   :  { %v1364_v2 = vmax.f32 %v564_v43, 0.0  ;;  %v568_v14 = vadd.f32 %v567_v48, %v1244_v17  ;;  %v915_v48 = vsel %vm170_vm9, 1.0, %v1161_v52 }
 0x349   :  { %v1367_v49 = vmax.f32 %v566_v13, 0.0  ;;  %v916_v13 = vsel %vm171_vm8, 1.0, %v1161_v52  ;;  %vm588_vm0 = vcmp.ne.f32.partialorder %v1361_v47, 0.0 }
 0x34a   :  { %v1369_v50 = vmax.f32 %v568_v14, 0.0  ;;  %v612_v53 = vadd.f32 %v1364_v2, %v1361_v47  ;;  %v628_v17 = vmax.f32 %v1361_v47, %v1364_v2 }
 0x34b   :  { %vm590_vm1 = vcmp.ne.f32.partialorder %v1367_v49, 0.0 }
 0x34c   :  { %v571_v54 = vpop.f32.mrb[12].mxu1  ;;  %613 = vadd.xlane.f32.xlu1 %v612_v53  ;;  %v615_v15 = vadd.f32 %v1369_v50, %v1367_v49  ;;  %v631_v0 = vmax.f32 %v1367_v49, %v1369_v50  ;;  %vm591_vm2 = vcmp.ne.f32.partialorder %v1369_v50, 0.0 }
 0x34d   :  { %v572_v55 = vadd.f32 %v571_v54, %v1248_v22  ;;  %v573_v56 = vpop.f32.mrb[13].mxu1  ;;  %v917_v54 = vsel %vm172_vm10, 1.0, %v1161_v52 }
 0x34e   :  { %v574_v57 = vadd.f32 %v573_v56, %v1248_v22  ;;  %v575_v58 = vpop.f32.mrb[14].mxu1  ;;  %616 = vadd.xlane.f32.xlu0 %v615_v15  ;;  %v918_v15 = vsel %vm173_vm11, 1.0, %v1161_v52 }
 0x34f   :  { %v1379_v59 = vmax.f32 %v572_v55, 0.0  ;;  %v576_v60 = vadd.f32 %v575_v58, %v1262_v32  ;;  %v577_v61 = vpop.f32.mrb[15].mxu1 }
 0x350   :  { %v1382_v62 = vmax.f32 %v574_v57, 0.0  ;;  %v578_v63 = vadd.f32 %v577_v61, %v1262_v32  ;;  %629 = vmax.xlane.f32.xlu1 %v628_v17  ;;  %v920_v61 = vsel %vm175_vm13, 1.0, %v1161_v52 }
 0x351   :  { %v1387_v1 = vmax.f32 %v576_v60, 0.0  ;;  %v919_v60 = vsel %vm174_vm12, 1.0, %v1161_v52 }
 0x352   :  { %v1389_v22 = vmax.f32 %v578_v63, 0.0  ;;  %632 = vmax.xlane.f32.xlu0 %v631_v0  ;;  %v618_v3 = vadd.f32 %v1382_v62, %v1379_v59  ;;  %v634_v32 = vmax.f32 %v1379_v59, %v1382_v62 }
 0x354   :  { %619 = vadd.xlane.f32.xlu1 %v618_v3  ;;  %v621_v4 = vadd.f32 %v1389_v22, %v1387_v1  ;;  %v637_v5 = vmax.f32 %v1387_v1, %v1389_v22 }
 0x356   :  { %622 = vadd.xlane.f32.xlu0 %v621_v4 }
 0x358   :  { %635 = vmax.xlane.f32.xlu1 %v634_v32 }
 0x35a   :  { %638 = vmax.xlane.f32.xlu0 %v637_v5  ;;  %v921_v5 = vsel %vm176_vm14, 1.0, %v1161_v52 }
 0x35c   :  { %407 = vadd.xlane.f32.xlu1 %v406_v6  ;;  %v922_v6 = vsel %vm177_vm15, 1.0, %v1161_v52 }
 0x35e   :  { %410 = vadd.xlane.f32.xlu0 %v409_v7 }
 0x360   :  { %413 = vadd.xlane.f32.xlu1 %v412_v10 }
 0x362   :  { %416 = vadd.xlane.f32.xlu0 %v415_v11 }
 0x3d9   :  { %v614_v12 = vpop.xlane.xlu1 %613 }
 0x3da   :  { %v624_v20 = vmul.f32 0.00390625, %v614_v12 }
 0x3db   :  { %v617_v16 = vpop.xlane.xlu0 %616 }
 0x3dc   :  { %v625_v24 = vmul.f32 0.00390625, %v617_v16 }
 0x3dd   :  { %v630_v19 = vpop.xlane.xlu1 %629 }
 0x3de   :  { %v640_v30 = vsel %vm223_vm3, %v624_v20, %v630_v19 }
 0x3df   :  { %v633_v25 = vpop.xlane.xlu0 %632 }
 0x3e0   :  { %v641_v31 = vsel %vm223_vm3, %v625_v24, %v633_v25 }
 0x3e1   :  { %v1038_v33 = vpack.c.bf16 %v641_v31, %v640_v30  ;;  %v620_v35 = vpop.xlane.xlu1 %619 }
 0x3e2   :  { %v626_v38 = vmul.f32 0.00390625, %v620_v35 }
 0x3e3   :  { %v623_v34 = vpop.xlane.xlu0 %622  ;;  %1039 = vmatpush3.bf16.msra.mxu0 %v1038_v33 }
 0x3e4   :  { %1040 = vmatprep.subr.bf16.mxu0 %v1159_v51  ;;  %v627_v36 = vmul.f32 0.00390625, %v623_v34 }
 0x3e5   :  { %v636_v37 = vpop.xlane.xlu1 %635 }
 0x3e6   :  { %v642_v41 = vsel %vm223_vm3, %v626_v38, %v636_v37 }
 0x3e7   :  { %v639_v40 = vpop.xlane.xlu0 %638 }
 0x3e8   :  { %v643_v43 = vsel %vm223_vm3, %v627_v36, %v639_v40  ;;  %vm589_vm3 = vcmp.ne.f32.partialorder %v1364_v2, 0.0 }
 0x3e9   :  { %v1041_v46 = vpack.c.bf16 %v643_v43, %v642_v41  ;;  %v408_v51 = vpop.xlane.xlu1 %407 }
 0x3ea   :  { %v418_v14 = vmul.f32 %v915_v48, %v408_v51  ;;  %v419_v53 = vmul.f32 %v916_v13, %v408_v51 }
 0x3eb   :  { %v411_v55 = vpop.xlane.xlu0 %410  ;;  %1042 = vmatpush3.bf16.msra.mxu0 %v1041_v46 }
 0x3ec   :  { %v929_v56 = vmul.f32 -1.442695, %v418_v14  ;;  %v930_v57 = vmul.f32 -1.442695, %v419_v53  ;;  %v420_v58 = vmul.f32 %v917_v54, %v411_v55  ;;  %v421_v17 = vmul.f32 %v918_v15, %v411_v55 }
 0x3ed   :  { %v414_v63 = vpop.xlane.xlu1 %413 }
 0x3ee   :  { %1070 = vpow2.f32 %v929_v56  ;;  %v931_v0 = vmul.f32 -1.442695, %v420_v58  ;;  %v932_v3 = vmul.f32 -1.442695, %v421_v17  ;;  %v422_v4 = vmul.f32 %v919_v60, %v414_v63  ;;  %1021 = vmatmul.mubr.msk.f32.vlgmr.msra.gmra.mrb[8].mxu0 %vm228_vm4, %v1302_v8 }
 0x3ef   :  { %1072 = vpow2.f32 %v930_v57  ;;  %v423_v32 = vmul.f32 %v920_v61, %v414_v63  ;;  %v417_v7 = vpop.xlane.xlu0 %416  ;;  %1025 = vmatprep.mubr.msk.f32.mxu0 %vm303_vm5, %v1309_v9  ;;  %vm592_vm4 = vcmp.ne.f32.partialorder %v1379_v59, 0.0 }
 0x3f0   :  { %1074 = vpow2.f32 %v931_v0  ;;  %v933_v10 = vmul.f32 -1.442695, %v422_v4  ;;  %v424_v11 = vmul.f32 %v921_v5, %v417_v7  ;;  %v425_v12 = vmul.f32 %v922_v6, %v417_v7 }
 0x3f1   :  { %1076 = vpow2.f32 %v932_v3  ;;  %v934_v8 = vmul.f32 -1.442695, %v423_v32  ;;  %v954_v32 = vsel %vm591_vm2, 1.0, %v1161_v52  ;;  %v952_v6 = vsel %vm589_vm3, 1.0, %v1161_v52 }
 0x3f2   :  { %1078 = vpow2.f32 %v933_v10  ;;  %v935_v16 = vmul.f32 -1.442695, %v424_v11  ;;  %v936_v19 = vmul.f32 -1.442695, %v425_v12 }
 0x3f3   :  { %1080 = vpow2.f32 %v934_v8 }
 0x3f4   :  { %1082 = vpow2.f32 %v935_v16 }
 0x3f5   :  { %1084 = vpow2.f32 %v936_v19 }
 0x3f8   :  { %v1071_v20 = vpop.eup %1070 }
 0x3f9   :  { %v1073_v24 = vpop.eup %1072  ;;  %v450_v25 = vadd.f32 1.0, %v1071_v20  ;;  %v955_v20 = vsel %vm592_vm4, 1.0, %v1161_v52 }
 0x3fa   :  { %v1075_v30 = vpop.eup %1074  ;;  %v451_v31 = vadd.f32 1.0, %v1073_v24 }
 0x3fb   :  { %v1077_v33 = vpop.eup %1076  ;;  %1086 = vrcp.f32 %v450_v25  ;;  %v452_v9 = vadd.f32 1.0, %v1075_v30 }
 0x3fc   :  { %v1079_v35 = vpop.eup %1078  ;;  %1088 = vrcp.f32 %v451_v31  ;;  %v453_v34 = vadd.f32 1.0, %v1077_v33 }
 0x3fd   :  { %v1081_v37 = vpop.eup %1080  ;;  %1090 = vrcp.f32 %v452_v9  ;;  %v454_v38 = vadd.f32 1.0, %v1079_v35 }
 0x3fe   :  { %v1083_v36 = vpop.eup %1082  ;;  %1092 = vrcp.f32 %v453_v34  ;;  %v455_v40 = vadd.f32 1.0, %v1081_v37 }
 0x3ff   :  { %v1085_v41 = vpop.eup %1084  ;;  %1094 = vrcp.f32 %v454_v38  ;;  %v456_v43 = vadd.f32 1.0, %v1083_v36 }
 0x400   :  { %1096 = vrcp.f32 %v455_v40  ;;  %v457_v46 = vadd.f32 1.0, %v1085_v41 }
 0x401   :  { %1098 = vrcp.f32 %v456_v43 }
 0x402   :  { %1100 = vrcp.f32 %v457_v46 }
 0x405   :  { %v1087_v13 = vpop.eup %1086 }
 0x406   :  { %v1089_v51 = vpop.eup %1088  ;;  %v474_v48 = vmul.f32 %v1087_v13, %v1250_v23 }
 0x407   :  { %v1091_v14 = vpop.eup %1090  ;;  %v475_v53 = vmul.f32 %v1089_v51, %v1253_v26 }
 0x408   :  { %v1093_v54 = vpop.eup %1092  ;;  %482 = vst [vmem:[#allocation2] sm:$0xff] %v474_v48  ;;  %v476_v15 = vmul.f32 %v1091_v14, %v1256_v28 }
 0x409   :  { %v1095_v55 = vpop.eup %1094  ;;  %483 = vst [vmem:[#allocation2 + $0x8] sm:$0xff] %v475_v53  ;;  %v477_v56 = vmul.f32 %v1093_v54, %v1258_v29 }
 0x40a   :  { %v1097_v57 = vpop.eup %1096  ;;  %484 = vst [vmem:[#allocation2 + $0x10] sm:$0xff] %v476_v15  ;;  %v478_v58 = vmul.f32 %v1095_v55, %v1270_v39 }
 0x40b   :  { %v1099_v17 = vpop.eup %1098  ;;  %485 = vst [vmem:[#allocation2 + $0x18] sm:$0xff] %v477_v56  ;;  %v479_v60 = vmul.f32 %v1097_v57, %v1273_v42 }
 0x40c   :  { %v1101_v23 = vpop.eup %1100  ;;  %486 = vst [vmem:[#allocation2 + $0x20] sm:$0xff] %v478_v58  ;;  %v480_v26 = vmul.f32 %v1099_v17, %v1276_v44 }
 0x40d   :  { %487 = vst [vmem:[#allocation2 + $0x28] sm:$0xff] %v479_v60  ;;  %v481_v61 = vmul.f32 %v1101_v23, %v1278_v45 }
 0x40e   :  { %488 = vst [vmem:[#allocation2 + $0x30] sm:$0xff] %v480_v26 }
 0x40f   :  { %489 = vst [vmem:[#allocation2 + $0x38] sm:$0xff] %v481_v61 }
 0x4c1   :  { %v710_v28 = vpop.f32.mrb[8].mxu0 }
 0x4c2   :  { %v714_v63 = vmax.f32 %v710_v28, 0.0  ;;  %v1022_v29 = vpop.f32.mrb[9].mxu0 }
 0x4c4   :  { %1023 = vmatprep.subr.msk.mxu0 %vm316_vm6, %v714_v63 }
 0x4c5   :  { %1024 = vmatpush3.msk.msra.mxu0 %vm316_vm6, %v714_v63  ;;  %vm595_vm6 = vcmp.ne.f32.partialorder %v1389_v22, 0.0 }
 0x4c6   :  { %1026 = vmatmul.mubr.msk.f32.vlgmr.msra.gmra.mrb[10].mxu0 %vm303_vm5, %v1319_v18  ;;  %v958_v31 = vsel %vm595_vm6, 1.0, %v1161_v52 }
 0x4c7   :  { %1028 = vmatprep.mubr.msk.f32.mxu0 %vm303_vm5, %v1331_v21  ;;  %v951_v21 = vsel %vm588_vm0, 1.0, %v1161_v52 }
 0x4ca   :  { %1029 = vmatmul.mubr.msk.f32.gmra.mrb[12].mxu0 %vm303_vm5, %v1347_v27  ;;  %v953_v27 = vsel %vm590_vm1, 1.0, %v1161_v52  ;;  %vm594_vm5 = vcmp.ne.f32.partialorder %v1387_v1, 0.0 }
 0x4cb   :  { %v957_v30 = vsel %vm594_vm5, 1.0, %v1161_v52 }
 0x599   :  { %v1027_v39 = vpop.f32.mrb[10].mxu0 }
 0x59a   :  { %v784_v42 = vpop.f32.mrb[11].mxu0  ;;  %v806_v44 = vsel %vm405_vm7, %v1027_v39, 0.0 }
 0x59b   :  { %807 = vadd.xlane.f32.xlu0 %v806_v44  ;;  %v803_v45 = vsel %vm405_vm7, %v784_v42, 0.0 }
 0x59c   :  { %804 = vadd.xlane.f32.xlu1 %v803_v45 }
 0x59d   :  { %v1030_v0 = vpop.f32.mrb[12].mxu0 }
 0x59e   :  { %v794_v3 = vpop.f32.mrb[13].mxu0  ;;  %v812_v4 = vsel %vm405_vm7, %v1030_v0, 0.0 }
 0x59f   :  { %813 = vadd.xlane.f32.xlu0 %v812_v4  ;;  %v809_v18 = vsel %vm405_vm7, %v794_v3, 0.0  ;;  %vm593_vm7 = vcmp.ne.f32.partialorder %v1382_v62, 0.0 }
 0x5a0   :  { %810 = vadd.xlane.f32.xlu1 %v809_v18  ;;  %v956_v34 = vsel %vm593_vm7, 1.0, %v1161_v52 }
 0x628   :  { %v808_v5 = vpop.xlane.xlu0 %807 }
 0x629   :  { %v817_v7 = vmul.f32 %v953_v27, %v808_v5  ;;  %v818_v10 = vmul.f32 %v954_v32, %v808_v5  ;;  %v805_v11 = vpop.xlane.xlu1 %804 }
 0x62a   :  { %v815_v12 = vmul.f32 %v951_v21, %v805_v11  ;;  %v816_v8 = vmul.f32 %v952_v6, %v805_v11 }
 0x62b   :  { %v967_v16 = vmul.f32 -1.442695, %v817_v7  ;;  %v968_v19 = vmul.f32 -1.442695, %v818_v10 }
 0x62c   :  { %v965_v24 = vmul.f32 -1.442695, %v815_v12  ;;  %v966_v25 = vmul.f32 -1.442695, %v816_v8  ;;  %v814_v33 = vpop.xlane.xlu0 %813 }
 0x62d   :  { %1102 = vpow2.f32 %v967_v16  ;;  %v821_v9 = vmul.f32 %v957_v30, %v814_v33  ;;  %v822_v35 = vmul.f32 %v958_v31, %v814_v33  ;;  %v811_v37 = vpop.xlane.xlu1 %810 }
 0x62e   :  { %1104 = vpow2.f32 %v968_v19  ;;  %v819_v38 = vmul.f32 %v955_v20, %v811_v37  ;;  %v820_v36 = vmul.f32 %v956_v34, %v811_v37 }
 0x62f   :  { %1106 = vpow2.f32 %v965_v24  ;;  %v971_v40 = vmul.f32 -1.442695, %v821_v9  ;;  %v972_v41 = vmul.f32 -1.442695, %v822_v35 }
 0x630   :  { %1108 = vpow2.f32 %v966_v25  ;;  %v969_v43 = vmul.f32 -1.442695, %v819_v38  ;;  %v970_v46 = vmul.f32 -1.442695, %v820_v36 }
 0x631   :  { %1110 = vpow2.f32 %v971_v40 }
 0x632   :  { %1112 = vpow2.f32 %v972_v41 }
 0x633   :  { %1114 = vpow2.f32 %v969_v43 }
 0x634   :  { %1116 = vpow2.f32 %v970_v46 }
 0x637   :  { %v1103_v13 = vpop.eup %1102 }
 0x638   :  { %v1105_v51 = vpop.eup %1104  ;;  %v849_v48 = vadd.f32 1.0, %v1103_v13 }
 0x639   :  { %v1107_v14 = vpop.eup %1106  ;;  %v850_v53 = vadd.f32 1.0, %v1105_v51 }
 0x63a   :  { %v1109_v52 = vpop.eup %1108  ;;  %1118 = vrcp.f32 %v849_v48  ;;  %v847_v54 = vadd.f32 1.0, %v1107_v14 }
 0x63b   :  { %v1111_v15 = vpop.eup %1110  ;;  %1120 = vrcp.f32 %v850_v53  ;;  %v848_v55 = vadd.f32 1.0, %v1109_v52 }
 0x63c   :  { %v1113_v56 = vpop.eup %1112  ;;  %1122 = vrcp.f32 %v847_v54  ;;  %v853_v57 = vadd.f32 1.0, %v1111_v15 }
 0x63d   :  { %v1115_v58 = vpop.eup %1114  ;;  %1124 = vrcp.f32 %v848_v55  ;;  %v854_v17 = vadd.f32 1.0, %v1113_v56 }
 0x63e   :  { %v1117_v60 = vpop.eup %1116  ;;  %1126 = vrcp.f32 %v853_v57  ;;  %v851_v23 = vadd.f32 1.0, %v1115_v58 }
 0x63f   :  { %1128 = vrcp.f32 %v854_v17  ;;  %v852_v26 = vadd.f32 1.0, %v1117_v60 }
 0x640   :  { %1130 = vrcp.f32 %v851_v23 }
 0x641   :  { %1132 = vrcp.f32 %v852_v26 }
 0x644   :  { %v1119_v61 = vpop.eup %1118 }
 0x645   :  { %v1121_v28 = vpop.eup %1120  ;;  %v873_v63 = vmul.f32 %v1119_v61, %v1367_v49 }
 0x646   :  { %v1123_v29 = vpop.eup %1122  ;;  %v874_v39 = vmul.f32 %v1121_v28, %v1369_v50 }
 0x647   :  { %v1125_v42 = vpop.eup %1124  ;;  %882 = vst [vmem:[#allocation2 + $0x50] sm:$0xff] %v873_v63  ;;  %v871_v44 = vmul.f32 %v1123_v29, %v1361_v47 }
 0x648   :  { %v1127_v45 = vpop.eup %1126  ;;  %883 = vst [vmem:[#allocation2 + $0x58] sm:$0xff] %v874_v39  ;;  %v872_v0 = vmul.f32 %v1125_v42, %v1364_v2 }
 0x649   :  { %v1129_v3 = vpop.eup %1128  ;;  %880 = vst [vmem:[#allocation2 + $0x40] sm:$0xff] %v871_v44  ;;  %v877_v4 = vmul.f32 %v1127_v45, %v1387_v1 }
 0x64a   :  { %v1131_v18 = vpop.eup %1130  ;;  %881 = vst [vmem:[#allocation2 + $0x48] sm:$0xff] %v872_v0  ;;  %v878_v49 = vmul.f32 %v1129_v3, %v1389_v22 }
 0x64b   :  { %v1133_v21 = vpop.eup %1132  ;;  %886 = vst [vmem:[#allocation2 + $0x70] sm:$0xff] %v877_v4  ;;  %v875_v50 = vmul.f32 %v1131_v18, %v1379_v59 }
 0x64c   :  { %887 = vst [vmem:[#allocation2 + $0x78] sm:$0xff] %v878_v49  ;;  %v876_v47 = vmul.f32 %v1133_v21, %v1382_v62 }
 0x64d   :  { %884 = vst [vmem:[#allocation2 + $0x60] sm:$0xff] %v875_v50 }
 0x64e   :  { %885 = vst [vmem:[#allocation2 + $0x68] sm:$0xff] %v876_v47 }
 0x64f   :  { %1145 = shalt.err (!%p1142_p4)
}
 0x650   :  { %s1146_s10 = scalar_lea.hbm %s1493_s5, 2048 }
 0x651   :  { %p1147_p5 = scmp.ne.s32.totalorder %s1493_s5, %s1146_s10  ;;  %p1150_p6 = scmp.lt.u32.totalorder %s1146_s10, %s1493_s5 }
 0x653   :  { %p1152_p7 = pnand %p1150_p6, %p1147_p5 }
 0x655   :  { %1155 = shalt.err (!%p1152_p7)
}
 0x656   :  { %s1163_s1 = smov 256   ;;  %s1164_s14 = smov 16  }
 0x657   :  { %899 = dma.vmem_to_hbm [thread:$0]  %s894_s4, 2048, %s1493_s5, [#allocation3], %s1163_s1, %s1163_s1, %s1164_s14  }
 0x658   :  { %1156 = dma.done.wait [#allocation3], 2048  }
 0x659   :  { %1157 = vsyncadd [#allocation3], 4294965248 }
 0x65a   :  { %903 = vsyncpa [#allocation3], 1 }

</bundles_post_ra>
